<compile_context>
chip_gen: v6e
topology: v6e:2x2x1
jax: 0.10.0
libtpu: 0.0.40
codegen_flags: <defaults>
</compile_context>

<pallas_src>
import functools

import jax
import jax.numpy as jnp
from jax.experimental import pallas as pl
from jax.experimental.pallas import tpu as pltpu


def _shift_concat_kernel(mins_ref, x_ref, o_ref, *, hp, use_roll):
    """One (batch, channel-chunk, group) grid step.

    mins_ref: SMEM (4,) float32   crop-min fills: left-up, left-down,
              right-up, right-down (PyTorch concat order).
    x_ref:    VMEM (1, Cc, S, S)    input tile (re-used across the 5 groups).
    o_ref:    VMEM (1, 1, Cc, S, S) output tile for the current group.
    """
    Cc = x_ref.shape[1]
    S = x_ref.shape[-1]
    V = S - hp                      # cropped-window extent (hp >= 1 here)
    g = pl.program_id(2)            # 0 = identity, 1..4 = shifted groups

    @pl.when(g == 0)
    def _():
        o_ref[0, 0] = x_ref[0]

    # (crop_h, crop_w, shift_h, shift_w) per mode, in the PyTorch concat order.
    modes = (
        (hp, hp, 0, 0),   # left-up
        (0, hp, hp, 0),   # left-down
        (hp, 0, 0, hp),   # right-up
        (0, 0, hp, hp),   # right-down
    )

    for m, (ch, cw, sh, sw) in enumerate(modes):

        @pl.when(g == m + 1)
        def _(m=m, ch=ch, cw=cw, sh=sh, sw=sw):
            fill = mins_ref[m].astype(o_ref.dtype)   # f32 SMEM -> out dtype

            if use_roll:
                # Shift the whole slab on the XLU, mask the uncovered border,
                # emit a single full, lane-aligned store for the group.
                x = x_ref[0]                              # (Cc, S, S)
                r = pltpu.roll(x, (sh - ch) % S, 1)       # sublane (H) shift
                r = pltpu.roll(r, (sw - cw) % S, 2)       # lane    (W) shift
                rows = jax.lax.broadcasted_iota(jnp.int32, (S, S), 0)
                cols = jax.lax.broadcasted_iota(jnp.int32, (S, S), 1)
                bad = ((rows < sh) | (rows >= sh + V) |
                       (cols < sw) | (cols >= sw + V))    # uncovered border
                o_ref[0, 0] = jnp.where(bad, fill, r)
            else:
                # General fallback: place the cropped window, then fill only
                # the uncovered hp-wide border strips (corner cells written
                # twice with the same value, benign).
                o_ref[0, 0, :, sh:sh + V, sw:sw + V] = (
                    x_ref[0, :, ch:ch + V, cw:cw + V])
                r0 = 0 if sh > 0 else V   # rows not covered by the window
                c0 = 0 if sw > 0 else V   # cols not covered by the window
                o_ref[0, 0, :, r0:r0 + hp, :] = jnp.full(
                    (Cc, hp, S), fill, o_ref.dtype)
                o_ref[0, 0, :, :, c0:c0 + hp] = jnp.full(
                    (Cc, S, hp), fill, o_ref.dtype)


_TILE_VMEM_BUDGET = 32 * 1024 * 1024   # bytes budgeted for pipelined tiles


def shifted_concatenate(images, image_size, patch_size, *, c_block=None):
    """images: (B, C, S, S) with S == image_size. Returns (B, 5*C, S, S)."""
    B, C, H, W = images.shape
    assert H == image_size and W == image_size, "module assumes square image_size"
    S = image_size
    hp = patch_size // 2

    if hp == 0:
        # Degenerate case: every crop is the full image -> five identical copies.
        return jnp.concatenate([images] * 5, axis=1)
    assert hp < S, "patch_size // 2 must be smaller than image_size"

    V = S - hp
    itemsize = images.dtype.itemsize

    # Fill values = global min of each cropped region. Reduce over (B, C) once
    # to an (S, S) min-map, then the four crop mins are reductions over tiny
    # slices of that map (one full HBM read instead of four overlapping ones).
    m2d = jnp.min(images, axis=(0, 1))
    mins = jnp.stack([
        jnp.min(m2d[hp:, hp:]),   # left-up crop
        jnp.min(m2d[:V, hp:]),    # left-down crop
        jnp.min(m2d[hp:, :V]),    # right-up crop
        jnp.min(m2d[:V, :V]),     # right-down crop
    ]).astype(jnp.float32)        # SMEM scalars are 32-bit; cast in-kernel.

    # Roll fast path requires 128-aligned spatial dims (XLU rotate alignment)
    # and a 32-bit element type; otherwise take the always-lowerable fallback.
    use_roll = (S % 128 == 0) and (itemsize == 4)

    # Per grid step (group axis split): 2 x input block + 2 x output block
    #   = 4 * c_block * S^2 * itemsize  (double buffering).
    if c_block is None:
        per_c = 4 * S * S * itemsize
        max_c = max(1, _TILE_VMEM_BUDGET // per_c)
        c_block = max(d for d in range(1, C + 1) if C % d == 0 and d <= max_c)
        # Keep >= 2 parallel grid steps when possible (v7x has 2 TensorCores).
        if B * (C // c_block) < 2:
            smaller = [d for d in range(1, C) if C % d == 0 and d <= max_c]
            if smaller:
                c_block = max(smaller)
    assert C % c_block == 0

    vmem_needed = 4 * c_block * S * S * itemsize + (2 << 20)
    vmem_limit = int(min(max(vmem_needed, 32 << 20), 64 << 20))

    kernel = functools.partial(_shift_concat_kernel, hp=hp, use_roll=use_roll)
    out5 = pl.pallas_call(
        kernel,
        out_shape=jax.ShapeDtypeStruct((B, 5, C, S, S), images.dtype),
        grid_spec=pltpu.PrefetchScalarGridSpec(
            num_scalar_prefetch=1,                     # mins -> SMEM
            grid=(B, C // c_block, 5),
            in_specs=[
                # Input index_map ignores the group axis, so each (b, c) tile
                # is DMA'd once and reused for all 5 group steps.
                pl.BlockSpec((1, c_block, S, S),
                             lambda b, c, g, mins: (b, c, 0, 0)),
            ],
            out_specs=pl.BlockSpec((1, 1, c_block, S, S),
                                   lambda b, c, g, mins: (b, g, c, 0, 0)),
        ),
        compiler_params=pltpu.CompilerParams(
            dimension_semantics=("parallel", "parallel", "arbitrary"),
            vmem_limit_bytes=vmem_limit),
        cost_estimate=pl.CostEstimate(
            flops=0, transcendentals=0,
            bytes_accessed=6 * B * C * S * S * itemsize),
    )(mins, images)

    # (B, 5, C, S, S) -> (B, 5C, S, S): contiguous-dim merge, no data movement.
    return out5.reshape(B, 5 * C, S, S)


def _reference(images, image_size, patch_size):
    """Pure-JAX mirror of the PyTorch ShiftedConcatenator.forward."""
    hp = patch_size // 2
    S = image_size

    def crop_shift_pad(ch, cw, sh, sw):
        crop = images[:, :, ch:ch + S - hp, cw:cw + S - hp]
        canvas = jnp.full((images.shape[0], images.shape[1], S, S),
                          jnp.min(crop), dtype=images.dtype)
        return canvas.at[:, :, sh:sh + crop.shape[2],
                         sw:sw + crop.shape[3]].set(crop)

    return jnp.concatenate([
        images,
        crop_shift_pad(hp, hp, 0, 0),   # left-up
        crop_shift_pad(0, hp, hp, 0),   # left-down
        crop_shift_pad(hp, 0, 0, hp),   # right-up
        crop_shift_pad(0, 0, hp, hp),   # right-down
    ], axis=1)


if __name__ == "__main__":
    key = jax.random.PRNGKey(0)
    k_small, k_aligned = jax.random.split(key)

    # Case 1: small, unaligned spatial size -> exercises the slice/strip
    # fallback path.
    B, C, S, patch = 2, 4, 16, 4
    x_small = jax.random.normal(k_small, (B, C, S, S), dtype=jnp.float32)
    out = jax.block_until_ready(shifted_concatenate(x_small, S, patch))
    ref = _reference(x_small, S, patch)
    assert out.shape == (B, 5 * C, S, S)
    assert jnp.allclose(out, ref, atol=1e-6, rtol=1e-6), "mismatch (fallback path)"

    # Case 2: 128-aligned spatial size -> exercises the roll + iota-mask
    # single-store fast path.
    S2, patch2 = 128, 8
    x_big = jax.random.normal(k_aligned, (B, C, S2, S2), dtype=jnp.float32)
    out2 = jax.block_until_ready(shifted_concatenate(x_big, S2, patch2))
    ref2 = _reference(x_big, S2, patch2)
    assert out2.shape == (B, 5 * C, S2, S2)
    assert jnp.allclose(out2, ref2, atol=1e-6, rtol=1e-6), "mismatch (roll path)"

    print("KERNEL_OK")
</pallas_src>

<mosaic_0001>
module attributes {stable_mosaic.version = 11 : i64} {
  func.func @_shift_concat_kernel(%arg0: i32, %arg1: i32, %arg2: i32, %arg3: memref<4xf32, #tpu.memory_space<smem>>, %arg4: memref<1x4x16x16xf32, #tpu.memory_space<vmem>>, %arg5: memref<1x1x4x16x16xf32, #tpu.memory_space<vmem>>) attributes {dimension_semantics = [#tpu.dimension_semantics<parallel>, #tpu.dimension_semantics<parallel>, #tpu.dimension_semantics<arbitrary>], iteration_bounds = array<i64: 2, 1, 5>, scalar_prefetch = 1 : i64, scratch_operands = 0 : i64, tpu.core_type = #tpu.core_type<tc>, window_params = [{transform_indices = @transform_0, window_bounds = array<i64: 1, 4, 16, 16>}, {transform_indices = @transform_1, window_bounds = array<i64: 1, 1, 4, 16, 16>}]} {
    %c0_i32 = arith.constant 0 : i32
    %0 = arith.cmpi eq, %arg2, %c0_i32 : i32
    %1 = arith.extui %0 : i1 to i32
    %c0_i32_0 = arith.constant 0 : i32
    %2 = arith.cmpi ne, %1, %c0_i32_0 : i32
    scf.if %2 {
      %c0 = arith.constant 0 : index
      %c0_5 = arith.constant 0 : index
      %c0_6 = arith.constant 0 : index
      %c0_7 = arith.constant 0 : index
      %15 = vector.load %arg4[%c0, %c0_5, %c0_6, %c0_7] : memref<1x4x16x16xf32, #tpu.memory_space<vmem>>, vector<1x4x16x16xf32>
      %16 = vector.shape_cast %15 : vector<1x4x16x16xf32> to vector<4x16x16xf32>
      %c0_8 = arith.constant 0 : index
      %c0_9 = arith.constant 0 : index
      %c0_10 = arith.constant 0 : index
      %c0_11 = arith.constant 0 : index
      %c0_12 = arith.constant 0 : index
      %17 = vector.load %arg5[%c0_8, %c0_9, %c0_10, %c0_11, %c0_12] : memref<1x1x4x16x16xf32, #tpu.memory_space<vmem>>, vector<1x1x4x16x16xf32>
      %18 = vector.shape_cast %17 : vector<1x1x4x16x16xf32> to vector<4x16x16xf32>
      %19 = vector.shape_cast %16 : vector<4x16x16xf32> to vector<1x1x4x16x16xf32>
      tpu.vector_store %arg5[%c0_8, %c0_9, %c0_10, %c0_11, %c0_12], %19 {strides = array<i32>} : memref<1x1x4x16x16xf32, #tpu.memory_space<vmem>>, vector<1x1x4x16x16xf32>,
    } else {
    }
    %c1_i32 = arith.constant 1 : i32
    %3 = arith.cmpi eq, %arg2, %c1_i32 : i32
    %4 = arith.extui %3 : i1 to i32
    %c0_i32_1 = arith.constant 0 : i32
    %5 = arith.cmpi ne, %4, %c0_i32_1 : i32
    scf.if %5 {
      %c0 = arith.constant 0 : index
      %15 = memref.load %arg3[%c0] : memref<4xf32, #tpu.memory_space<smem>>
      %c0_5 = arith.constant 0 : index
      %c0_6 = arith.constant 0 : index
      %c2 = arith.constant 2 : index
      %c2_7 = arith.constant 2 : index
      %16 = vector.load %arg4[%c0_5, %c0_6, %c2, %c2_7] : memref<1x4x16x16xf32, #tpu.memory_space<vmem>>, vector<1x4x14x14xf32>
      %17 = vector.shape_cast %16 : vector<1x4x14x14xf32> to vector<4x14x14xf32>
      %c0_8 = arith.constant 0 : index
      %c0_9 = arith.constant 0 : index
      %c0_10 = arith.constant 0 : index
      %c0_11 = arith.constant 0 : index
      %c0_12 = arith.constant 0 : index
      %18 = vector.load %arg5[%c0_8, %c0_9, %c0_10, %c0_11, %c0_12] : memref<1x1x4x16x16xf32, #tpu.memory_space<vmem>>, vector<1x1x4x14x14xf32>
      %19 = vector.shape_cast %18 : vector<1x1x4x14x14xf32> to vector<4x14x14xf32>
      %20 = vector.shape_cast %17 : vector<4x14x14xf32> to vector<1x1x4x14x14xf32>
      tpu.vector_store %arg5[%c0_8, %c0_9, %c0_10, %c0_11, %c0_12], %20 {strides = array<i32>} : memref<1x1x4x16x16xf32, #tpu.memory_space<vmem>>, vector<1x1x4x14x14xf32>,
      %21 = vector.broadcast %15 : f32 to vector<4x2x16xf32>
      %c0_13 = arith.constant 0 : index
      %c0_14 = arith.constant 0 : index
      %c0_15 = arith.constant 0 : index
      %c14 = arith.constant 14 : index
      %c0_16 = arith.constant 0 : index
      %22 = vector.load %arg5[%c0_13, %c0_14, %c0_15, %c14, %c0_16] : memref<1x1x4x16x16xf32, #tpu.memory_space<vmem>>, vector<1x1x4x2x16xf32>
      %23 = vector.shape_cast %22 : vector<1x1x4x2x16xf32> to vector<4x2x16xf32>
      %24 = vector.shape_cast %21 : vector<4x2x16xf32> to vector<1x1x4x2x16xf32>
      tpu.vector_store %arg5[%c0_13, %c0_14, %c0_15, %c14, %c0_16], %24 {strides = array<i32>} : memref<1x1x4x16x16xf32, #tpu.memory_space<vmem>>, vector<1x1x4x2x16xf32>,
      %25 = vector.broadcast %15 : f32 to vector<4x16x2xf32>
      %c0_17 = arith.constant 0 : index
      %c0_18 = arith.constant 0 : index
      %c0_19 = arith.constant 0 : index
      %c0_20 = arith.constant 0 : index
      %c14_21 = arith.constant 14 : index
      %26 = vector.load %arg5[%c0_17, %c0_18, %c0_19, %c0_20, %c14_21] : memref<1x1x4x16x16xf32, #tpu.memory_space<vmem>>, vector<1x1x4x16x2xf32>
      %27 = vector.shape_cast %26 : vector<1x1x4x16x2xf32> to vector<4x16x2xf32>
      %28 = vector.shape_cast %25 : vector<4x16x2xf32> to vector<1x1x4x16x2xf32>
      tpu.vector_store %arg5[%c0_17, %c0_18, %c0_19, %c0_20, %c14_21], %28 {strides = array<i32>} : memref<1x1x4x16x16xf32, #tpu.memory_space<vmem>>, vector<1x1x4x16x2xf32>,
    } else {
    }
    %c2_i32 = arith.constant 2 : i32
    %6 = arith.cmpi eq, %arg2, %c2_i32 : i32
    %7 = arith.extui %6 : i1 to i32
    %c0_i32_2 = arith.constant 0 : i32
    %8 = arith.cmpi ne, %7, %c0_i32_2 : i32
    scf.if %8 {
      %c1 = arith.constant 1 : index
      %15 = memref.load %arg3[%c1] : memref<4xf32, #tpu.memory_space<smem>>
      %c0 = arith.constant 0 : index
      %c0_5 = arith.constant 0 : index
      %c0_6 = arith.constant 0 : index
      %c2 = arith.constant 2 : index
      %16 = vector.load %arg4[%c0, %c0_5, %c0_6, %c2] : memref<1x4x16x16xf32, #tpu.memory_space<vmem>>, vector<1x4x14x14xf32>
      %17 = vector.shape_cast %16 : vector<1x4x14x14xf32> to vector<4x14x14xf32>
      %c0_7 = arith.constant 0 : index
      %c0_8 = arith.constant 0 : index
      %c0_9 = arith.constant 0 : index
      %c2_10 = arith.constant 2 : index
      %c0_11 = arith.constant 0 : index
      %18 = vector.load %arg5[%c0_7, %c0_8, %c0_9, %c2_10, %c0_11] : memref<1x1x4x16x16xf32, #tpu.memory_space<vmem>>, vector<1x1x4x14x14xf32>
      %19 = vector.shape_cast %18 : vector<1x1x4x14x14xf32> to vector<4x14x14xf32>
      %20 = vector.shape_cast %17 : vector<4x14x14xf32> to vector<1x1x4x14x14xf32>
      tpu.vector_store %arg5[%c0_7, %c0_8, %c0_9, %c2_10, %c0_11], %20 {strides = array<i32>} : memref<1x1x4x16x16xf32, #tpu.memory_space<vmem>>, vector<1x1x4x14x14xf32>,
      %21 = vector.broadcast %15 : f32 to vector<4x2x16xf32>
      %c0_12 = arith.constant 0 : index
      %c0_13 = arith.constant 0 : index
      %c0_14 = arith.constant 0 : index
      %c0_15 = arith.constant 0 : index
      %c0_16 = arith.constant 0 : index
      %22 = vector.load %arg5[%c0_12, %c0_13, %c0_14, %c0_15, %c0_16] : memref<1x1x4x16x16xf32, #tpu.memory_space<vmem>>, vector<1x1x4x2x16xf32>
      %23 = vector.shape_cast %22 : vector<1x1x4x2x16xf32> to vector<4x2x16xf32>
      %24 = vector.shape_cast %21 : vector<4x2x16xf32> to vector<1x1x4x2x16xf32>
      tpu.vector_store %arg5[%c0_12, %c0_13, %c0_14, %c0_15, %c0_16], %24 {strides = array<i32>} : memref<1x1x4x16x16xf32, #tpu.memory_space<vmem>>, vector<1x1x4x2x16xf32>,
      %25 = vector.broadcast %15 : f32 to vector<4x16x2xf32>
      %c0_17 = arith.constant 0 : index
      %c0_18 = arith.constant 0 : index
      %c0_19 = arith.constant 0 : index
      %c0_20 = arith.constant 0 : index
      %c14 = arith.constant 14 : index
      %26 = vector.load %arg5[%c0_17, %c0_18, %c0_19, %c0_20, %c14] : memref<1x1x4x16x16xf32, #tpu.memory_space<vmem>>, vector<1x1x4x16x2xf32>
      %27 = vector.shape_cast %26 : vector<1x1x4x16x2xf32> to vector<4x16x2xf32>
      %28 = vector.shape_cast %25 : vector<4x16x2xf32> to vector<1x1x4x16x2xf32>
      tpu.vector_store %arg5[%c0_17, %c0_18, %c0_19, %c0_20, %c14], %28 {strides = array<i32>} : memref<1x1x4x16x16xf32, #tpu.memory_space<vmem>>, vector<1x1x4x16x2xf32>,
    } else {
    }
    %c3_i32 = arith.constant 3 : i32
    %9 = arith.cmpi eq, %arg2, %c3_i32 : i32
    %10 = arith.extui %9 : i1 to i32
    %c0_i32_3 = arith.constant 0 : i32
    %11 = arith.cmpi ne, %10, %c0_i32_3 : i32
    scf.if %11 {
      %c2 = arith.constant 2 : index
      %15 = memref.load %arg3[%c2] : memref<4xf32, #tpu.memory_space<smem>>
      %c0 = arith.constant 0 : index
      %c0_5 = arith.constant 0 : index
      %c2_6 = arith.constant 2 : index
      %c0_7 = arith.constant 0 : index
      %16 = vector.load %arg4[%c0, %c0_5, %c2_6, %c0_7] : memref<1x4x16x16xf32, #tpu.memory_space<vmem>>, vector<1x4x14x14xf32>
      %17 = vector.shape_cast %16 : vector<1x4x14x14xf32> to vector<4x14x14xf32>
      %c0_8 = arith.constant 0 : index
      %c0_9 = arith.constant 0 : index
      %c0_10 = arith.constant 0 : index
      %c0_11 = arith.constant 0 : index
      %c2_12 = arith.constant 2 : index
      %18 = vector.load %arg5[%c0_8, %c0_9, %c0_10, %c0_11, %c2_12] : memref<1x1x4x16x16xf32, #tpu.memory_space<vmem>>, vector<1x1x4x14x14xf32>
      %19 = vector.shape_cast %18 : vector<1x1x4x14x14xf32> to vector<4x14x14xf32>
      %20 = vector.shape_cast %17 : vector<4x14x14xf32> to vector<1x1x4x14x14xf32>
      tpu.vector_store %arg5[%c0_8, %c0_9, %c0_10, %c0_11, %c2_12], %20 {strides = array<i32>} : memref<1x1x4x16x16xf32, #tpu.memory_space<vmem>>, vector<1x1x4x14x14xf32>,
      %21 = vector.broadcast %15 : f32 to vector<4x2x16xf32>
      %c0_13 = arith.constant 0 : index
      %c0_14 = arith.constant 0 : index
      %c0_15 = arith.constant 0 : index
      %c14 = arith.constant 14 : index
      %c0_16 = arith.constant 0 : index
      %22 = vector.load %arg5[%c0_13, %c0_14, %c0_15, %c14, %c0_16] : memref<1x1x4x16x16xf32, #tpu.memory_space<vmem>>, vector<1x1x4x2x16xf32>
      %23 = vector.shape_cast %22 : vector<1x1x4x2x16xf32> to vector<4x2x16xf32>
      %24 = vector.shape_cast %21 : vector<4x2x16xf32> to vector<1x1x4x2x16xf32>
      tpu.vector_store %arg5[%c0_13, %c0_14, %c0_15, %c14, %c0_16], %24 {strides = array<i32>} : memref<1x1x4x16x16xf32, #tpu.memory_space<vmem>>, vector<1x1x4x2x16xf32>,
      %25 = vector.broadcast %15 : f32 to vector<4x16x2xf32>
      %c0_17 = arith.constant 0 : index
      %c0_18 = arith.constant 0 : index
      %c0_19 = arith.constant 0 : index
      %c0_20 = arith.constant 0 : index
      %c0_21 = arith.constant 0 : index
      %26 = vector.load %arg5[%c0_17, %c0_18, %c0_19, %c0_20, %c0_21] : memref<1x1x4x16x16xf32, #tpu.memory_space<vmem>>, vector<1x1x4x16x2xf32>
      %27 = vector.shape_cast %26 : vector<1x1x4x16x2xf32> to vector<4x16x2xf32>
      %28 = vector.shape_cast %25 : vector<4x16x2xf32> to vector<1x1x4x16x2xf32>
      tpu.vector_store %arg5[%c0_17, %c0_18, %c0_19, %c0_20, %c0_21], %28 {strides = array<i32>} : memref<1x1x4x16x16xf32, #tpu.memory_space<vmem>>, vector<1x1x4x16x2xf32>,
    } else {
    }
    %c4_i32 = arith.constant 4 : i32
    %12 = arith.cmpi eq, %arg2, %c4_i32 : i32
    %13 = arith.extui %12 : i1 to i32
    %c0_i32_4 = arith.constant 0 : i32
    %14 = arith.cmpi ne, %13, %c0_i32_4 : i32
    scf.if %14 {
      %c3 = arith.constant 3 : index
      %15 = memref.load %arg3[%c3] : memref<4xf32, #tpu.memory_space<smem>>
      %c0 = arith.constant 0 : index
      %c0_5 = arith.constant 0 : index
      %c0_6 = arith.constant 0 : index
      %c0_7 = arith.constant 0 : index
      %16 = vector.load %arg4[%c0, %c0_5, %c0_6, %c0_7] : memref<1x4x16x16xf32, #tpu.memory_space<vmem>>, vector<1x4x14x14xf32>
      %17 = vector.shape_cast %16 : vector<1x4x14x14xf32> to vector<4x14x14xf32>
      %c0_8 = arith.constant 0 : index
      %c0_9 = arith.constant 0 : index
      %c0_10 = arith.constant 0 : index
      %c2 = arith.constant 2 : index
      %c2_11 = arith.constant 2 : index
      %18 = vector.load %arg5[%c0_8, %c0_9, %c0_10, %c2, %c2_11] : memref<1x1x4x16x16xf32, #tpu.memory_space<vmem>>, vector<1x1x4x14x14xf32>
      %19 = vector.shape_cast %18 : vector<1x1x4x14x14xf32> to vector<4x14x14xf32>
      %20 = vector.shape_cast %17 : vector<4x14x14xf32> to vector<1x1x4x14x14xf32>
      tpu.vector_store %arg5[%c0_8, %c0_9, %c0_10, %c2, %c2_11], %20 {strides = array<i32>} : memref<1x1x4x16x16xf32, #tpu.memory_space<vmem>>, vector<1x1x4x14x14xf32>,
      %21 = vector.broadcast %15 : f32 to vector<4x2x16xf32>
      %c0_12 = arith.constant 0 : index
      %c0_13 = arith.constant 0 : index
      %c0_14 = arith.constant 0 : index
      %c0_15 = arith.constant 0 : index
      %c0_16 = arith.constant 0 : index
      %22 = vector.load %arg5[%c0_12, %c0_13, %c0_14, %c0_15, %c0_16] : memref<1x1x4x16x16xf32, #tpu.memory_space<vmem>>, vector<1x1x4x2x16xf32>
      %23 = vector.shape_cast %22 : vector<1x1x4x2x16xf32> to vector<4x2x16xf32>
      %24 = vector.shape_cast %21 : vector<4x2x16xf32> to vector<1x1x4x2x16xf32>
      tpu.vector_store %arg5[%c0_12, %c0_13, %c0_14, %c0_15, %c0_16], %24 {strides = array<i32>} : memref<1x1x4x16x16xf32, #tpu.memory_space<vmem>>, vector<1x1x4x2x16xf32>,
      %25 = vector.broadcast %15 : f32 to vector<4x16x2xf32>
      %c0_17 = arith.constant 0 : index
      %c0_18 = arith.constant 0 : index
      %c0_19 = arith.constant 0 : index
      %c0_20 = arith.constant 0 : index
      %c0_21 = arith.constant 0 : index
      %26 = vector.load %arg5[%c0_17, %c0_18, %c0_19, %c0_20, %c0_21] : memref<1x1x4x16x16xf32, #tpu.memory_space<vmem>>, vector<1x1x4x16x2xf32>
      %27 = vector.shape_cast %26 : vector<1x1x4x16x2xf32> to vector<4x16x2xf32>
      %28 = vector.shape_cast %25 : vector<4x16x2xf32> to vector<1x1x4x16x2xf32>
      tpu.vector_store %arg5[%c0_17, %c0_18, %c0_19, %c0_20, %c0_21], %28 {strides = array<i32>} : memref<1x1x4x16x16xf32, #tpu.memory_space<vmem>>, vector<1x1x4x16x2xf32>,
    } else {
    }
    return
  }
  func.func @transform_0(%arg0: i32, %arg1: i32, %arg2: i32, %arg3: memref<4xf32, #tpu.memory_space<smem>>) -> (i32, i32, i32, i32) {
    %c0_i32 = arith.constant 0 : i32
    %c0_i32_0 = arith.constant 0 : i32
    %c0_i32_1 = arith.constant 0 : i32
    return %arg0, %arg1, %c0_i32, %c0_i32_0 : i32, i32, i32, i32
  }
  func.func @transform_1(%arg0: i32, %arg1: i32, %arg2: i32, %arg3: memref<4xf32, #tpu.memory_space<smem>>) -> (i32, i32, i32, i32, i32) {
    %c0_i32 = arith.constant 0 : i32
    %c0_i32_0 = arith.constant 0 : i32
    %c0_i32_1 = arith.constant 0 : i32
    return %arg0, %arg2, %arg1, %c0_i32, %c0_i32_0 : i32, i32, i32, i32, i32
  }
}

</mosaic_0001>

<bundles_post_ra>
// kernel: tpu_custom_call.1
= control target key start
LH: loop header
LB: loop body
LE: loop exit
PB: predicated region body
PF: predicated region fallthrough
CT: control target
= control target key end

     0   :  { %s881_s9 = smov [#allocation3]   ;;  %s1293_s0 = inlined_call_operand.hbm [shape: f32[4], index: 0, kind: input, shape index: {}]   ;;  %s1294_s1 = inlined_call_operand.hbm [shape: f32[2,4,16,16], index: 1, kind: input, shape index: {}]   ;;  %s1295_s2 = inlined_call_operand.hbm [shape: f32[2,5,4,16,16], index: 2, kind: output, shape index: {}]  }
   0x1   :  { %8 = dma.hbm_to_smem %s1293_s0, 16, %s881_s9, [#allocation2] }
   0x2   :  { %827 = dma.done.wait [#allocation2], 16 }
   0x3   :  { %828 = vsyncadd [#allocation2], 4294967280 }
   0x4   :  { %10 = sfence }
   0x5   :  { %11 = vsyncpa [#allocation5], 0 }
   0x6   :  { %13 = vsyncpa [#allocation5 + $0x1], 0 }
   0x7   :  { %14 = vsyncpa [#allocation6], 0 }
   0x8   :  { %16 = vsyncpa [#allocation6 + $0x1], 0  ;;  %s910_s12 = smov 0   ;;  %s912_s13 = smov 0  }
   0x9   :  { %s914_s14 = smov 0   ;;  %s916_s15 = smov 0  }
   0xa   :  { %s918_s16 = smov 0   ;;  %s920_s17 = smov 0  }
   0xb   :  { %s922_s0 = smov 0   ;;  %s924_s18 = smov 0  }
   0xc   :  { %s926_s19 = smov 0   ;;  %s928_s20 = smov 0  }
   0xd   :  { %s930_s21 = smov 0  }
   0xe LB: > { %s585_s22 = sadd.s32 4294967295, %s879_s21   ;;  %s586_s23 = sadd.s32 4294967294, %s879_s21   ;;  %s879_s21 = sphi %s930_s21, %s22_s21   ;;  %s875_s20 = sphi %s928_s20, %s1313_s20   ;;  %s871_s19 = sphi %s926_s19, %s1312_s19   ;;  %s867_s18 = sphi %s924_s18, %s1311_s18   ;;  %s863_s0 = sphi %s922_s0, %s1310_s0   ;;  %s859_s17 = sphi %s920_s17, %s1309_s17   ;;  %s855_s16 = sphi %s918_s16, %s1308_s16   ;;  %s851_s15 = sphi %s916_s15, %s1307_s15   ;;  %s847_s14 = sphi %s914_s14, %s1306_s14   ;;  %s843_s13 = sphi %s912_s13, %s1305_s13   ;;  %s839_s12 = sphi %s910_s12, %s1304_s12  }
   0xf   : > { %s34_s24 = sadd.s32 1, %s871_s19  ;;  %s41_s25 = sadd.s32 1, %s875_s20 }
  0x10   : > { %p35_p0 = scmp.ge.s32.totalorder %s34_s24, 5  ;;  %s50_s26 = sadd.s32 1, %s859_s17 }
  0x11   : > { %p57_p1 = scmp.ne.s32.totalorder %s859_s17, %s855_s16  ;;  %p58_p2 = scmp.eq.s32.totalorder %s879_s21, 0 }
  0x12   : > { %s1315_s24 = smov (%p35_p0, %s34_s24), 0  ;;  %s1317_s25 = smov (!%p35_p0, %s41_s25), %s875_s20 }
  0x13   : > { %p974_p3 = por %p58_p2, %p57_p1  ;;  %p63_p4 = scmp.ne.s32.totalorder %s855_s16, %s851_s15 }
  0x14   : > { %p43_p5 = scmp.ge.s32.totalorder %s1317_s25, 2  ;;  %p64_p6 = scmp.eq.s32.totalorder %s585_s22, 0 }
  0x15   : > { %s74_s28 = ssub.s32 %s871_s19, %s1315_s24  ;;  %s80_s29 = sadd.s32 1, %s847_s14 }
  0x16   : > { %s1319_s25 = smov (%p43_p5, %s1317_s25), 0  ;;  %p984_p7 = por %p64_p6, %p63_p4 }
  0x17   : > { %1298 = sst [smem:[#allocation11_spill]] %s1319_s25  ;;  %p90_p8 = scmp.ne.s32.totalorder %s847_s14, %s843_s13 }
  0x18   : > { %s45_s3 = ssub.s32 %s875_s20, %s1319_s25  ;;  %p91_p9 = scmp.eq.s32.totalorder %s585_s22, 9 }
  0x19   : > { %p48_p10 = scmp.eq.s32.totalorder %s45_s3, 0  ;;  %s75_s4 = sor.u32 %s74_s28, %s45_s3 }
  0x1a   : > { %p78_p11 = scmp.eq.s32.totalorder %s75_s4, 0  ;;  %p992_p12 = por %p91_p9, %p90_p8 }
  0x1b   : > { %s997_s6 = scalar_select %p48_p10, %s859_s17, %s50_s26  }
  0x1c   : > { %s1000_s7 = scalar_select %p78_p11, %s847_s14, %s80_s29  }
  0x1d   : > { %p96_p13 = scmp.ne.s32.totalorder %s843_s13, %s839_s12  ;;  %p97_p0 = scmp.eq.s32.totalorder %s586_s23, 9 }
  0x1e   : > { %p622_p1 = scmp.lt.s32.totalorder %s879_s21, 10  ;;  %s117_s9 = sand.u32 1, %s859_s17  }
  0x1f   : > { %p1005_p2 = por %p97_p0, %p96_p13  ;;  %s589_s10 = sshll.u32 %s117_s9, 6 }
  0x20   : > { %s608_s11 = sshll.u32 %s875_s20, 10  ;;  %s121_s3 = scalar_lea.vmem [#allocation4], %s589_s10 }
  0x21   : > { %s130_s28 = scalar_lea.hbm %s1294_s1, %s608_s11  ;;  %s131_s4 = sshll.u32 %s121_s3, 4  ;;  %s132_s4 = int_to_ptr.vmem [resolvable:$true] %s131_s4 }
  0x22   : > { %p1016_p4 = pnand %p622_p1, %p974_p3  ;;  %p592_p5 = scmp.ge.s32.totalorder %s879_s21, 1 }
  0x23   : > { %s118_s23 = scalar_lea.sflag [#allocation5], %s117_s9  ;;  %s742_s29 = scalar_lea.vmem %s132_s4, 1024 }
  0x24   : > { %p731_p6 = pneg %p1016_p4  ;;  %p743_p8 = scmp.ne.s32.totalorder %s132_s4, %s742_s29 }
  0x25   : > { %s882_s25 = smov [#allocation4]  }
  0x26   : > { %p745_p9 = pnand %p743_p8, %p731_p6  ;;  %s747_s15 = sshll.u32 %s882_s25, 4  ;;  %s748_s15 = int_to_ptr.vmem [resolvable:$false] %s747_s15 }
  0x27   : > { %s749_s10 = scalar_lea.vmem %s748_s15, 2048  ;;  %p750_p11 = scmp.lt.s32.totalorder %s132_s4, %s748_s15 }
  0x28   : > { %p746_p10 = pneg %p745_p9  ;;  %p751_p13 = scmp.lt.s32.totalorder %s749_s10, %s742_s29 }
  0x2a   : > { %p752_p0 = por %p751_p13, %p750_p11 }
  0x2c   : > { %p753_p3 = pnand %p752_p0, %p746_p10 }
  0x2e   : > { %756 = shalt.err (!%p753_p3)
}
  0x2f   : > { %s883_s27 = smov 128   ;;  %s884_s9 = smov 8  }
  0x30   : > { %617 = dma.hbm_to_vmem [thread:$0]  (!%p1016_p4), %s130_s28, 1024, %s132_s4, %s118_s23, %s883_s27, %s883_s27, %s884_s9  }
  0x31   : > { %p139_p1 = scmp.lt.s32.totalorder %s879_s21, 11 }
  0x33   : > { %p140_p6 = pnand %p592_p5, %p139_p1 }
  0x34   : > { %s145_s25 = sand.u32 (!%p140_p6), 1, %s855_s16  }
  0x35   : > { %143 = sbr.rel (%p140_p6) target bundleno = 649 (0x289), region = 24  ;;  %s593_s11 = sshll.u32 (!%p140_p6), %s145_s25, 6 }
  0x36   : > { %s146_s22 = scalar_lea.sflag (!%p140_p6), [#allocation5], %s145_s25  ;;  %s1029_s3 = scalar_lea.vmem (!%p140_p6), [#allocation4], %s593_s11 }
  0x3a   : > { %830 = dma.done.wait (%p984_p7), %s146_s22, 1024  }
  0x3b   : > { %832 = vsyncadd (%p984_p7), %s146_s22, 4294966272  ;;  %s165_s26 = sand.u32 1, %s843_s13   ;;  %p595_p4 = scmp.ne.s32.totalorder %s863_s0, 0 }
  0x3c   : > { %s594_s28 = sshll.u32 %s165_s26, 6 }
  0x3d   : > { %s1038_s4 = scalar_lea.vmem [#allocation7], %s594_s28  ;;  %173 = sbr.rel (%p595_p4) target bundleno = 71 (0x47), region = 32 }
  0x42   : > { %v174_v0 = vld [vmem:[%s1029_s3] sm:$0xff]  ;;  %vm182_vm0 = vcmask 130048   ;;  %v175_v1 = vld [vmem:[%s1029_s3 + $0x8] sm:$0xff]  ;;  %v176_v2 = vld [vmem:[%s1029_s3 + $0x10] sm:$0xff] }
  0x43   : > { %183 = vst.msk [vmem:[%s1038_s4] sm:$0xff] %vm182_vm0, %v174_v0  ;;  %184 = vst.msk [vmem:[%s1038_s4 + $0x8] sm:$0xff] %vm182_vm0, %v175_v1  ;;  %v177_v3 = vld [vmem:[%s1029_s3 + $0x18] sm:$0xff]  ;;  %v178_v4 = vld [vmem:[%s1029_s3 + $0x20] sm:$0xff] }
  0x44   : > { %185 = vst.msk [vmem:[%s1038_s4 + $0x10] sm:$0xff] %vm182_vm0, %v176_v2  ;;  %v179_v5 = vld [vmem:[%s1029_s3 + $0x28] sm:$0xff]  ;;  %186 = vst.msk [vmem:[%s1038_s4 + $0x18] sm:$0xff] %vm182_vm0, %v177_v3  ;;  %v180_v6 = vld [vmem:[%s1029_s3 + $0x30] sm:$0xff] }
  0x45   : > { %187 = vst.msk [vmem:[%s1038_s4 + $0x20] sm:$0xff] %vm182_vm0, %v178_v4  ;;  %188 = vst.msk [vmem:[%s1038_s4 + $0x28] sm:$0xff] %vm182_vm0, %v179_v5  ;;  %v181_v7 = vld [vmem:[%s1029_s3 + $0x38] sm:$0xff] }
  0x46   : > { %189 = vst.msk [vmem:[%s1038_s4 + $0x30] sm:$0xff] %vm182_vm0, %v180_v6  ;;  %190 = vst.msk [vmem:[%s1038_s4 + $0x38] sm:$0xff] %vm182_vm0, %v181_v7 }
  0x47 PF: > { %p596_p7 = scmp.ne.s32.totalorder %s863_s0, 1 }
  0x48   : > { %s885_s30 = smov (!%p596_p7), 126   ;;  %s195_s23 = sld [smem:[#allocation3]] (!%p596_p7) }
  0x49   : > { %194 = sbr.rel (%p596_p7) target bundleno = 209 (0xd1), region = 36 }
  0x4e   : > { %v198_v8 = vld [vmem:[%s1029_s3 + $0x12] sm:$0xff]  ;;  %v196_v9 = vld [vmem:[%s1029_s3 + $0x2] sm:$0xff]  ;;  %v199_v10 = vld [vmem:[%s1029_s3 + $0x1a] sm:$0x3f]  ;;  %vm247_vm1 = vcmask 123904   ;;  %v246_v14 = vstv %s195_s23  ;;  %vm236_vm2 = vcmask 113664  }
  0x4f   : > { %216 = vrot.lane.b32.xlu1 %v198_v8, %s885_s30  ;;  %212 = vrot.lane.b32.xlu0 %v196_v9, %s885_s30  ;;  %v197_v11 = vld [vmem:[%s1029_s3 + $0xa] sm:$0x3f]  ;;  %v200_v13 = vld [vmem:[%s1029_s3 + $0x22] sm:$0xff]  ;;  %vm252_vm3 = vcmask 130160   ;;  %vm238_vm4 = vcmask 111616  }
  0x50   : > { %v201_v12 = vld [vmem:[%s1029_s3 + $0x2a] sm:$0x3f]  ;;  %249 = vst.msk [vmem:[%s1038_s4 + $0x1e] sm:$0x3] %vm247_vm1, %v246_v14  ;;  %248 = vst.msk [vmem:[%s1038_s4 + $0xe] sm:$0x3] %vm247_vm1, %v246_v14 }
  0x51   : > { %250 = vst.msk [vmem:[%s1038_s4 + $0x2e] sm:$0x3] %vm247_vm1, %v246_v14  ;;  %251 = vst.msk [vmem:[%s1038_s4 + $0x3e] sm:$0x3] %vm247_vm1, %v246_v14  ;;  %v203_v15 = vld [vmem:[%s1029_s3 + $0x3a] sm:$0x3f] }
  0x52   : > { %v202_v16 = vld [vmem:[%s1029_s3 + $0x32] sm:$0xff] }
  0x53   : > { %218 = vrot.lane.b32.xlu1 %v199_v10, %s885_s30  ;;  %214 = vrot.lane.b32.xlu0 %v197_v11, %s885_s30 }
  0x57   : > { %222 = vrot.lane.b32.xlu1 %v201_v12, %s885_s30  ;;  %220 = vrot.lane.b32.xlu0 %v200_v13, %s885_s30 }
  0x5b   : > { %226 = vrot.lane.b32.xlu1 %v203_v15, %s885_s30  ;;  %224 = vrot.lane.b32.xlu0 %v202_v16, %s885_s30 }
  0xc1   : > { %v217_v17 = vpop.permute.xlu1 %216  ;;  %v213_v18 = vpop.permute.xlu0 %212 }
  0xc2   : > { %240 = vst.msk [vmem:[%s1038_s4 + $0x10] sm:$0xff] %vm236_vm2, %v217_v17  ;;  %237 = vst.msk [vmem:[%s1038_s4] sm:$0xff] %vm236_vm2, %v213_v18 }
  0xc3   : > { %255 = vst.msk [vmem:[%s1038_s4 + $0x10] sm:$0xff] %vm252_vm3, %v246_v14  ;;  %253 = vst.msk [vmem:[%s1038_s4] sm:$0xff] %vm252_vm3, %v246_v14 }
  0xc5   : > { %v219_v19 = vpop.permute.xlu1 %218  ;;  %v215_v20 = vpop.permute.xlu0 %214 }
  0xc6   : > { %241 = vst.msk [vmem:[%s1038_s4 + $0x18] sm:$0x3f] %vm238_vm4, %v219_v19  ;;  %239 = vst.msk [vmem:[%s1038_s4 + $0x8] sm:$0x3f] %vm238_vm4, %v215_v20 }
  0xc7   : > { %256 = vst.msk [vmem:[%s1038_s4 + $0x18] sm:$0xff] %vm252_vm3, %v246_v14  ;;  %254 = vst.msk [vmem:[%s1038_s4 + $0x8] sm:$0xff] %vm252_vm3, %v246_v14 }
  0xc9   : > { %v223_v21 = vpop.permute.xlu1 %222  ;;  %v221_v22 = vpop.permute.xlu0 %220 }
  0xca   : > { %243 = vst.msk [vmem:[%s1038_s4 + $0x28] sm:$0x3f] %vm238_vm4, %v223_v21 }
  0xcb   : > { %242 = vst.msk [vmem:[%s1038_s4 + $0x20] sm:$0xff] %vm236_vm2, %v221_v22 }
  0xcc   : > { %258 = vst.msk [vmem:[%s1038_s4 + $0x28] sm:$0xff] %vm252_vm3, %v246_v14  ;;  %257 = vst.msk [vmem:[%s1038_s4 + $0x20] sm:$0xff] %vm252_vm3, %v246_v14 }
  0xcd   : > { %v227_v23 = vpop.permute.xlu1 %226  ;;  %v225_v24 = vpop.permute.xlu0 %224 }
  0xce   : > { %245 = vst.msk [vmem:[%s1038_s4 + $0x38] sm:$0x3f] %vm238_vm4, %v227_v23 }
  0xcf   : > { %244 = vst.msk [vmem:[%s1038_s4 + $0x30] sm:$0xff] %vm236_vm2, %v225_v24 }
  0xd0   : > { %260 = vst.msk [vmem:[%s1038_s4 + $0x38] sm:$0xff] %vm252_vm3, %v246_v14  ;;  %259 = vst.msk [vmem:[%s1038_s4 + $0x30] sm:$0xff] %vm252_vm3, %v246_v14 }
  0xd1 PF: > { %p597_p5 = scmp.ne.s32.totalorder %s863_s0, 2 }
  0xd2   : > { %s886_s29 = smov (!%p597_p5), 126   ;;  %s598_s15 = sld [smem:[#allocation3 + $0x1]] (!%p597_p5) }
  0xd3   : > { %264 = sbr.rel (%p597_p5) target bundleno = 347 (0x15b), region = 40 }
  0xd8   : > { %v268_v25 = vld [vmem:[%s1029_s3 + $0x10] sm:$0xff]  ;;  %v266_v26 = vld [vmem:[%s1029_s3] sm:$0xff]  ;;  %v269_v27 = vld [vmem:[%s1029_s3 + $0x18] sm:$0x3f]  ;;  %vm317_vm5 = vcmask 123904   ;;  %v316_v31 = vstv %s598_s15  ;;  %vm306_vm6 = vcmask 113664  }
  0xd9   : > { %286 = vrot.lane.b32.xlu1 %v268_v25, %s886_s29  ;;  %282 = vrot.lane.b32.xlu0 %v266_v26, %s886_s29  ;;  %v267_v28 = vld [vmem:[%s1029_s3 + $0x8] sm:$0x3f]  ;;  %v270_v30 = vld [vmem:[%s1029_s3 + $0x20] sm:$0xff]  ;;  %vm322_vm7 = vcmask 130160   ;;  %vm308_vm8 = vcmask 111616  }
  0xda   : > { %v271_v29 = vld [vmem:[%s1029_s3 + $0x28] sm:$0x3f]  ;;  %319 = vst.msk [vmem:[%s1038_s4 + $0x10] sm:$0x3] %vm317_vm5, %v316_v31  ;;  %318 = vst.msk [vmem:[%s1038_s4] sm:$0x3] %vm317_vm5, %v316_v31 }
  0xdb   : > { %320 = vst.msk [vmem:[%s1038_s4 + $0x20] sm:$0x3] %vm317_vm5, %v316_v31  ;;  %321 = vst.msk [vmem:[%s1038_s4 + $0x30] sm:$0x3] %vm317_vm5, %v316_v31  ;;  %v273_v32 = vld [vmem:[%s1029_s3 + $0x38] sm:$0x3f] }
  0xdc   : > { %v272_v33 = vld [vmem:[%s1029_s3 + $0x30] sm:$0xff] }
  0xdd   : > { %288 = vrot.lane.b32.xlu1 %v269_v27, %s886_s29  ;;  %284 = vrot.lane.b32.xlu0 %v267_v28, %s886_s29 }
  0xe1   : > { %292 = vrot.lane.b32.xlu1 %v271_v29, %s886_s29  ;;  %290 = vrot.lane.b32.xlu0 %v270_v30, %s886_s29 }
  0xe5   : > { %296 = vrot.lane.b32.xlu1 %v273_v32, %s886_s29  ;;  %294 = vrot.lane.b32.xlu0 %v272_v33, %s886_s29 }
 0x14b   : > { %v287_v34 = vpop.permute.xlu1 %286  ;;  %v283_v35 = vpop.permute.xlu0 %282 }
 0x14c   : > { %310 = vst.msk [vmem:[%s1038_s4 + $0x12] sm:$0xff] %vm306_vm6, %v287_v34  ;;  %307 = vst.msk [vmem:[%s1038_s4 + $0x2] sm:$0xff] %vm306_vm6, %v283_v35 }
 0x14d   : > { %325 = vst.msk [vmem:[%s1038_s4 + $0x10] sm:$0xff] %vm322_vm7, %v316_v31  ;;  %323 = vst.msk [vmem:[%s1038_s4] sm:$0xff] %vm322_vm7, %v316_v31 }
 0x14f   : > { %v289_v36 = vpop.permute.xlu1 %288  ;;  %v285_v37 = vpop.permute.xlu0 %284 }
 0x150   : > { %311 = vst.msk [vmem:[%s1038_s4 + $0x1a] sm:$0x3f] %vm308_vm8, %v289_v36  ;;  %309 = vst.msk [vmem:[%s1038_s4 + $0xa] sm:$0x3f] %vm308_vm8, %v285_v37 }
 0x151   : > { %326 = vst.msk [vmem:[%s1038_s4 + $0x18] sm:$0xff] %vm322_vm7, %v316_v31  ;;  %324 = vst.msk [vmem:[%s1038_s4 + $0x8] sm:$0xff] %vm322_vm7, %v316_v31 }
 0x153   : > { %v293_v38 = vpop.permute.xlu1 %292  ;;  %v291_v39 = vpop.permute.xlu0 %290 }
 0x154   : > { %313 = vst.msk [vmem:[%s1038_s4 + $0x2a] sm:$0x3f] %vm308_vm8, %v293_v38 }
 0x155   : > { %312 = vst.msk [vmem:[%s1038_s4 + $0x22] sm:$0xff] %vm306_vm6, %v291_v39 }
 0x156   : > { %327 = vst.msk [vmem:[%s1038_s4 + $0x20] sm:$0xff] %vm322_vm7, %v316_v31  ;;  %328 = vst.msk [vmem:[%s1038_s4 + $0x28] sm:$0xff] %vm322_vm7, %v316_v31 }
 0x157   : > { %v297_v40 = vpop.permute.xlu1 %296  ;;  %v295_v41 = vpop.permute.xlu0 %294 }
 0x158   : > { %315 = vst.msk [vmem:[%s1038_s4 + $0x3a] sm:$0x3f] %vm308_vm8, %v297_v40 }
 0x159   : > { %314 = vst.msk [vmem:[%s1038_s4 + $0x32] sm:$0xff] %vm306_vm6, %v295_v41 }
 0x15a   : > { %329 = vst.msk [vmem:[%s1038_s4 + $0x30] sm:$0xff] %vm322_vm7, %v316_v31  ;;  %330 = vst.msk [vmem:[%s1038_s4 + $0x38] sm:$0xff] %vm322_vm7, %v316_v31 }
 0x15b PF: > { %p599_p8 = scmp.ne.s32.totalorder %s863_s0, 3 }
 0x15c   : > { %s887_s10 = smov (!%p599_p8), 2   ;;  %s600_s27 = sld [smem:[#allocation3 + $0x2]] (!%p599_p8) }
 0x15d   : > { %334 = sbr.rel (%p599_p8) target bundleno = 485 (0x1e5), region = 44 }
 0x162   : > { %v338_v42 = vld [vmem:[%s1029_s3 + $0x12] sm:$0xff]  ;;  %v336_v43 = vld [vmem:[%s1029_s3 + $0x2] sm:$0xff]  ;;  %v339_v44 = vld [vmem:[%s1029_s3 + $0x1a] sm:$0x3f]  ;;  %vm387_vm9 = vcmask 123904   ;;  %v386_v48 = vstv %s600_s27  ;;  %vm376_vm10 = vcmask 130064  }
 0x163   : > { %356 = vrot.lane.b32.xlu1 %v338_v42, %s887_s10  ;;  %352 = vrot.lane.b32.xlu0 %v336_v43, %s887_s10  ;;  %v337_v45 = vld [vmem:[%s1029_s3 + $0xa] sm:$0x3f]  ;;  %v340_v47 = vld [vmem:[%s1029_s3 + $0x22] sm:$0xff]  ;;  %vm392_vm11 = vcmask 15360   ;;  %vm378_vm12 = vcmask 128016  }
 0x164   : > { %v341_v46 = vld [vmem:[%s1029_s3 + $0x2a] sm:$0x3f]  ;;  %389 = vst.msk [vmem:[%s1038_s4 + $0x1e] sm:$0x3] %vm387_vm9, %v386_v48  ;;  %388 = vst.msk [vmem:[%s1038_s4 + $0xe] sm:$0x3] %vm387_vm9, %v386_v48 }
 0x165   : > { %390 = vst.msk [vmem:[%s1038_s4 + $0x2e] sm:$0x3] %vm387_vm9, %v386_v48  ;;  %391 = vst.msk [vmem:[%s1038_s4 + $0x3e] sm:$0x3] %vm387_vm9, %v386_v48  ;;  %v343_v49 = vld [vmem:[%s1029_s3 + $0x3a] sm:$0x3f] }
 0x166   : > { %v342_v50 = vld [vmem:[%s1029_s3 + $0x32] sm:$0xff] }
 0x167   : > { %358 = vrot.lane.b32.xlu1 %v339_v44, %s887_s10  ;;  %354 = vrot.lane.b32.xlu0 %v337_v45, %s887_s10 }
 0x16b   : > { %362 = vrot.lane.b32.xlu1 %v341_v46, %s887_s10  ;;  %360 = vrot.lane.b32.xlu0 %v340_v47, %s887_s10 }
 0x16f   : > { %366 = vrot.lane.b32.xlu1 %v343_v49, %s887_s10  ;;  %364 = vrot.lane.b32.xlu0 %v342_v50, %s887_s10 }
 0x1d5   : > { %v357_v51 = vpop.permute.xlu1 %356  ;;  %v353_v52 = vpop.permute.xlu0 %352 }
 0x1d6   : > { %380 = vst.msk [vmem:[%s1038_s4 + $0x10] sm:$0xff] %vm376_vm10, %v357_v51  ;;  %377 = vst.msk [vmem:[%s1038_s4] sm:$0xff] %vm376_vm10, %v353_v52 }
 0x1d7   : > { %395 = vst.msk [vmem:[%s1038_s4 + $0x10] sm:$0xff] %vm392_vm11, %v386_v48  ;;  %393 = vst.msk [vmem:[%s1038_s4] sm:$0xff] %vm392_vm11, %v386_v48 }
 0x1d9   : > { %v359_v53 = vpop.permute.xlu1 %358  ;;  %v355_v54 = vpop.permute.xlu0 %354 }
 0x1da   : > { %381 = vst.msk [vmem:[%s1038_s4 + $0x18] sm:$0x3f] %vm378_vm12, %v359_v53  ;;  %379 = vst.msk [vmem:[%s1038_s4 + $0x8] sm:$0x3f] %vm378_vm12, %v355_v54 }
 0x1db   : > { %396 = vst.msk [vmem:[%s1038_s4 + $0x18] sm:$0xff] %vm392_vm11, %v386_v48  ;;  %394 = vst.msk [vmem:[%s1038_s4 + $0x8] sm:$0xff] %vm392_vm11, %v386_v48 }
 0x1dd   : > { %v363_v55 = vpop.permute.xlu1 %362  ;;  %v361_v56 = vpop.permute.xlu0 %360 }
 0x1de   : > { %383 = vst.msk [vmem:[%s1038_s4 + $0x28] sm:$0x3f] %vm378_vm12, %v363_v55 }
 0x1df   : > { %382 = vst.msk [vmem:[%s1038_s4 + $0x20] sm:$0xff] %vm376_vm10, %v361_v56 }
 0x1e0   : > { %398 = vst.msk [vmem:[%s1038_s4 + $0x28] sm:$0xff] %vm392_vm11, %v386_v48  ;;  %397 = vst.msk [vmem:[%s1038_s4 + $0x20] sm:$0xff] %vm392_vm11, %v386_v48 }
 0x1e1   : > { %v367_v57 = vpop.permute.xlu1 %366  ;;  %v365_v58 = vpop.permute.xlu0 %364 }
 0x1e2   : > { %385 = vst.msk [vmem:[%s1038_s4 + $0x38] sm:$0x3f] %vm378_vm12, %v367_v57 }
 0x1e3   : > { %384 = vst.msk [vmem:[%s1038_s4 + $0x30] sm:$0xff] %vm376_vm10, %v365_v58 }
 0x1e4   : > { %400 = vst.msk [vmem:[%s1038_s4 + $0x38] sm:$0xff] %vm392_vm11, %v386_v48  ;;  %399 = vst.msk [vmem:[%s1038_s4 + $0x30] sm:$0xff] %vm392_vm11, %v386_v48 }
 0x1e5 PF: > { %p601_p9 = scmp.ne.s32.totalorder %s863_s0, 4 }
 0x1e6   : > { %s888_s9 = smov (!%p601_p9), 2   ;;  %s602_s25 = sld [smem:[#allocation3 + $0x3]] (!%p601_p9) }
 0x1e7   : > { %404 = sbr.rel (%p601_p9) target bundleno = 623 (0x26f), region = 48 }
 0x1ec   : > { %v408_v59 = vld [vmem:[%s1029_s3 + $0x10] sm:$0xff]  ;;  %v406_v60 = vld [vmem:[%s1029_s3] sm:$0xff]  ;;  %v409_v61 = vld [vmem:[%s1029_s3 + $0x18] sm:$0x3f]  ;;  %vm457_vm13 = vcmask 123904   ;;  %v456_v1 = vstv %s602_s25  ;;  %vm446_vm14 = vcmask 130064  }
 0x1ed   : > { %426 = vrot.lane.b32.xlu1 %v408_v59, %s888_s9  ;;  %422 = vrot.lane.b32.xlu0 %v406_v60, %s888_s9  ;;  %v407_v62 = vld [vmem:[%s1029_s3 + $0x8] sm:$0x3f]  ;;  %v410_v0 = vld [vmem:[%s1029_s3 + $0x20] sm:$0xff]  ;;  %vm462_vm15 = vcmask 15360   ;;  %vm448_vm0 = vcmask 128016  }
 0x1ee   : > { %v411_v63 = vld [vmem:[%s1029_s3 + $0x28] sm:$0x3f]  ;;  %459 = vst.msk [vmem:[%s1038_s4 + $0x10] sm:$0x3] %vm457_vm13, %v456_v1  ;;  %458 = vst.msk [vmem:[%s1038_s4] sm:$0x3] %vm457_vm13, %v456_v1 }
 0x1ef   : > { %460 = vst.msk [vmem:[%s1038_s4 + $0x20] sm:$0x3] %vm457_vm13, %v456_v1  ;;  %461 = vst.msk [vmem:[%s1038_s4 + $0x30] sm:$0x3] %vm457_vm13, %v456_v1  ;;  %v413_v2 = vld [vmem:[%s1029_s3 + $0x38] sm:$0x3f] }
 0x1f0   : > { %v412_v3 = vld [vmem:[%s1029_s3 + $0x30] sm:$0xff] }
 0x1f1   : > { %428 = vrot.lane.b32.xlu1 %v409_v61, %s888_s9  ;;  %424 = vrot.lane.b32.xlu0 %v407_v62, %s888_s9 }
 0x1f5   : > { %432 = vrot.lane.b32.xlu1 %v411_v63, %s888_s9  ;;  %430 = vrot.lane.b32.xlu0 %v410_v0, %s888_s9 }
 0x1f9   : > { %436 = vrot.lane.b32.xlu1 %v413_v2, %s888_s9  ;;  %434 = vrot.lane.b32.xlu0 %v412_v3, %s888_s9 }
 0x25f   : > { %v427_v4 = vpop.permute.xlu1 %426  ;;  %v423_v5 = vpop.permute.xlu0 %422 }
 0x260   : > { %450 = vst.msk [vmem:[%s1038_s4 + $0x12] sm:$0xff] %vm446_vm14, %v427_v4  ;;  %447 = vst.msk [vmem:[%s1038_s4 + $0x2] sm:$0xff] %vm446_vm14, %v423_v5 }
 0x261   : > { %465 = vst.msk [vmem:[%s1038_s4 + $0x10] sm:$0xff] %vm462_vm15, %v456_v1  ;;  %463 = vst.msk [vmem:[%s1038_s4] sm:$0xff] %vm462_vm15, %v456_v1 }
 0x263   : > { %v429_v6 = vpop.permute.xlu1 %428  ;;  %v425_v7 = vpop.permute.xlu0 %424 }
 0x264   : > { %451 = vst.msk [vmem:[%s1038_s4 + $0x1a] sm:$0x3f] %vm448_vm0, %v429_v6  ;;  %449 = vst.msk [vmem:[%s1038_s4 + $0xa] sm:$0x3f] %vm448_vm0, %v425_v7 }
 0x265   : > { %466 = vst.msk [vmem:[%s1038_s4 + $0x18] sm:$0xff] %vm462_vm15, %v456_v1  ;;  %464 = vst.msk [vmem:[%s1038_s4 + $0x8] sm:$0xff] %vm462_vm15, %v456_v1 }
 0x267   : > { %v433_v8 = vpop.permute.xlu1 %432  ;;  %v431_v9 = vpop.permute.xlu0 %430 }
 0x268   : > { %453 = vst.msk [vmem:[%s1038_s4 + $0x2a] sm:$0x3f] %vm448_vm0, %v433_v8 }
 0x269   : > { %452 = vst.msk [vmem:[%s1038_s4 + $0x22] sm:$0xff] %vm446_vm14, %v431_v9 }
 0x26a   : > { %467 = vst.msk [vmem:[%s1038_s4 + $0x20] sm:$0xff] %vm462_vm15, %v456_v1  ;;  %468 = vst.msk [vmem:[%s1038_s4 + $0x28] sm:$0xff] %vm462_vm15, %v456_v1 }
 0x26b   : > { %v437_v10 = vpop.permute.xlu1 %436  ;;  %v435_v11 = vpop.permute.xlu0 %434 }
 0x26c   : > { %455 = vst.msk [vmem:[%s1038_s4 + $0x3a] sm:$0x3f] %vm448_vm0, %v437_v10 }
 0x26d   : > { %454 = vst.msk [vmem:[%s1038_s4 + $0x32] sm:$0xff] %vm446_vm14, %v435_v11 }
 0x26e   : > { %469 = vst.msk [vmem:[%s1038_s4 + $0x30] sm:$0xff] %vm462_vm15, %v456_v1  ;;  %470 = vst.msk [vmem:[%s1038_s4 + $0x38] sm:$0xff] %vm462_vm15, %v456_v1 }
 0x26f PF: > { %s604_s11 = sshll.u32 %s863_s0, 3  ;;  %s609_s22 = smul.u32 40, %s867_s18 }
 0x270   : > { %s490_s3 = sshll.u32 %s1038_s4, 4  ;;  %s1233_s10 = scalar_lea.sflag [#allocation6], %s165_s26  ;;  %s1224_s3 = int_to_ptr.vmem [resolvable:$true] %s490_s3 }
 0x271   : > { %s487_s28 = sadd.s32 %s609_s22, %s604_s11  ;;  %s757_s27 = scalar_lea.vmem %s1224_s3, 1024 }
 0x272   : > { %s605_s30 = sshll.u32 %s487_s28, 7  ;;  %p758_p10 = scmp.ne.s32.totalorder %s1224_s3, %s757_s27 }
 0x273   : > { %s1229_s15 = scalar_lea.hbm %s1295_s2, %s605_s30  ;;  %s889_s0 = smov [#allocation7]  }
 0x274   : > { %p759_p11 = pnand %p758_p10, %p992_p12  ;;  %s761_s18 = sshll.u32 %s889_s0, 4  ;;  %s762_s18 = int_to_ptr.vmem [resolvable:$false] %s761_s18 }
 0x275   : > { %s763_s4 = scalar_lea.vmem %s762_s18, 2048  ;;  %p764_p0 = scmp.lt.s32.totalorder %s1224_s3, %s762_s18 }
 0x276   : > { %p760_p13 = pneg %p759_p11  ;;  %p765_p3 = scmp.lt.s32.totalorder %s763_s4, %s757_s27 }
 0x278   : > { %p766_p1 = por %p765_p3, %p764_p0 }
 0x27a   : > { %p767_p6 = pnand %p766_p1, %p760_p13 }
 0x27c   : > { %770 = shalt.err (!%p767_p6)
}
 0x27d   : > { %s771_s26 = scalar_lea.hbm %s1229_s15, 1024  ;;  %s775_s11 = scalar_lea.hbm %s1295_s2, 10240 }
 0x27e   : > { %p772_p4 = scmp.ne.s32.totalorder %s1229_s15, %s771_s26  ;;  %p776_p8 = scmp.lt.s32.totalorder %s1229_s15, %s1295_s2 }
 0x27f   : > { %p777_p9 = scmp.lt.s32.totalorder %s775_s11, %s771_s26 }
 0x280   : > { %p773_p7 = pnand %p772_p4, %p992_p12 }
 0x281   : > { %p778_p10 = por %p777_p9, %p776_p8 }
 0x282   : > { %p774_p5 = pneg %p773_p7 }
 0x284   : > { %p779_p11 = pnand %p778_p10, %p774_p5 }
 0x286   : > { %782 = shalt.err (!%p779_p11)
}
 0x287   : > { %s890_s30 = smov 128   ;;  %s891_s23 = smov 8  }
 0x288   : > { %612 = dma.vmem_to_hbm [thread:$0]  (%p992_p12), %s1224_s3, 1024, %s1229_s15, %s1233_s10, %s890_s30, %s890_s30, %s891_s23  }
 0x289 PF: > { %p623_p13 = scmp.ge.s32.totalorder %s879_s21, 2  ;;  %s505_s29 = sand.u32 1, %s839_s12  }
 0x28a   : > { %s506_s27 = scalar_lea.sflag [#allocation6], %s505_s29 }
 0x28b   : > { %p619_p0 = pnand %p623_p13, %p1005_p2 }
 0x28d   : > { %p620_p3 = pneg %p619_p0 }
 0x28f   : > { %834 = dma.done.wait (%p620_p3), %s506_s27, 1024  }
 0x290   : > { %836 = vsyncadd (%p620_p3), %s506_s27, 4294966272  ;;  %s22_s21 = sadd.s32 1, %s879_s21   ;;  %s1303_s5 = sld [smem:[#allocation11_spill]] }
 0x291   : > { %p19_p1 = scmp.ge.s32.totalorder %s22_s21, 12   ;;  %s1304_s12 = smov %s843_s13 }
 0x292   : > { %s1305_s13 = smov %s847_s14  ;;  %s1306_s14 = smov %s1000_s7 }
 0x293   : > { %s1307_s15 = smov %s855_s16  ;;  %s1308_s16 = smov %s859_s17 }
 0x294   : > { %s1309_s17 = smov %s997_s6  ;;  %s1310_s0 = smov %s871_s19 }
 0x295   : > { %s1311_s18 = smov %s875_s20  ;;  %s1312_s19 = smov %s1315_s24 }
 0x296   : > { %s1313_s20 = smov %s1303_s5  ;;  %21 = sbr.rel (!%p19_p1) target bundleno = 14 (0xe), region = 89 }
 0x29b   :  { %511 = vsyncpa [#allocation5], 1 }
 0x29c   :  { %513 = vsyncpa [#allocation5 + $0x1], 1 }
 0x29d   :  { %514 = vsyncpa [#allocation6], 1 }
 0x29e   :  { %516 = vsyncpa [#allocation6 + $0x1], 1 }

</bundles_post_ra>
